<compile_context>
chip_gen: v7x
topology: tpu7x:2x2x1
jax: 0.10.0
libtpu: 0.0.40
codegen_flags: <defaults>
</compile_context>

<pallas_src>
import jax
import jax.numpy as jnp
from jax.experimental import pallas as pl
from jax.experimental.pallas import tpu as pltpu

LEAKY_SLOPE = 0.01  # F.leaky_relu default negative_slope


def _layer1_kernel(hc_ref, w1t_ref, b1_ref, x_ref):
    # (B, 2E) @ (2E, E) -> (B, E): f32 accumulation, bias add, leaky_relu.
    x = jnp.dot(hc_ref[...], w1t_ref[...], preferred_element_type=jnp.float32)
    x = x + b1_ref[...]
    x = jnp.maximum(x, LEAKY_SLOPE * x)  # == leaky_relu for slope in (0, 1)
    # dropout: eval mode -> identity
    x_ref[...] = x.astype(x_ref.dtype)


def _layer2_kernel(x_ref, w2t_ref, b2_ref, o_ref):
    # (B, E) @ (E, tile_v) -> (B, tile_v): f32 accumulation, bias add.
    out = jnp.dot(x_ref[...], w2t_ref[...], preferred_element_type=jnp.float32)
    out = out + b2_ref[...]
    o_ref[...] = out.astype(o_ref.dtype)


def prepare_params(w1, b1, w2, b2, *, tile_v=2048, compute_dtype=None):
    """One-time weight prep (in real serving done once at weight-load time, not per call).

    PyTorch layouts: w1 (E, 2E), b1 (E,), w2 (V, E), b2 (V,).
    Returns MXU-native (K, N) weights, lane-dense vocab-padded w2/b2, and the tile size.
    """
    E = w1.shape[0]
    V = w2.shape[0]

    # Lane-dense w2 / output tiles: pad vocab up to a multiple of the (128-aligned) tile.
    v_rounded = ((V + 127) // 128) * 128
    tile_v = max(128, min((tile_v // 128) * 128, v_rounded))
    v_pad = pl.cdiv(V, tile_v) * tile_v

    w1t = w1.T  # (2E, E): native (K, N) orientation for the MXU
    w2t = w2.T  # (E, V):  native (K, N), vocab on the 128-lane axis
    if v_pad != V:
        w2t = jnp.pad(w2t, ((0, 0), (0, v_pad - V)))
        b2 = jnp.pad(b2, ((0, v_pad - V),))
    if compute_dtype is not None:
        w1t = w1t.astype(compute_dtype)
        w2t = w2t.astype(compute_dtype)
    b1_row = b1.reshape(1, E).astype(jnp.float32)      # biases stay f32
    b2_row = b2.reshape(1, v_pad).astype(jnp.float32)
    return w1t, b1_row, w2t, b2_row, tile_v, v_pad, V


def deep_output_layer(hidden, context, w1, b1, w2, b2, *, tile_v=2048, compute_dtype=None):
    """hidden, context: (B, E).  PyTorch layouts: w1 (E, 2E), b1 (E,), w2 (V, E), b2 (V,)."""
    B, E = hidden.shape
    out_dtype = hidden.dtype
    cdtype = jnp.dtype(compute_dtype) if compute_dtype is not None else jnp.dtype(out_dtype)

    w1t, b1_row, w2t, b2_row, tile_v, v_pad, V = prepare_params(
        w1, b1, w2, b2, tile_v=tile_v, compute_dtype=compute_dtype)

    # Fuse the two K=E matmuls of layer 1 into one K=2E matmul (cheap wrapper-side concat).
    hc = jnp.concatenate([hidden, context], axis=-1).astype(cdtype)  # (B, 2E)

    # --- Layer 1: computed ONCE, hoisted out of the vocab-tile loop. ---
    x = pl.pallas_call(
        _layer1_kernel,
        out_shape=jax.ShapeDtypeStruct((B, E), cdtype),
    )(hc, w1t, b1_row)

    # --- Layer 2: vocab-tiled; w2t/b2/out stream, x stays resident in VMEM. ---
    grid = (v_pad // tile_v,)

    # VMEM budget: resident x + double-buffered {w2 tile, b2 tile, out tile}, with headroom.
    csize = cdtype.itemsize
    osize = jnp.dtype(out_dtype).itemsize
    est_bytes = (B * E * csize
                 + 2 * (E * tile_v * csize + tile_v * 4 + B * tile_v * osize))
    vmem_limit = int(min(max(2 * est_bytes, 16 * 1024 * 1024), 64 * 1024 * 1024))

    out = pl.pallas_call(
        _layer2_kernel,
        out_shape=jax.ShapeDtypeStruct((B, v_pad), out_dtype),
        grid=grid,
        in_specs=[
            pl.BlockSpec((B, E), lambda j: (0, 0)),        # x    (resident across V tiles)
            pl.BlockSpec((E, tile_v), lambda j: (0, j)),   # w2t  tile (lane-dense, streamed)
            pl.BlockSpec((1, tile_v), lambda j: (0, j)),   # b2   tile
        ],
        out_specs=pl.BlockSpec((B, tile_v), lambda j: (0, j)),
        compiler_params=pltpu.CompilerParams(
            dimension_semantics=("parallel",),  # independent V tiles -> v7x megacore sharding
            vmem_limit_bytes=vmem_limit,
        ),
    )(x, w2t, b2_row)

    # Slice off the vocab pad (a downstream softmax must not see the zero logits).
    return out[:, :V] if v_pad != V else out


def deep_output_layer_ref(hidden, context, w1, b1, w2, b2):
    """Pure-JAX reference matching the PyTorch forward (eval mode)."""
    x = jnp.concatenate([hidden, context], axis=-1) @ w1.T + b1
    x = jnp.where(x > 0, x, LEAKY_SLOPE * x)
    return x @ w2.T + b2


if __name__ == "__main__":
    # Small shapes consistent with the module: embed_size=32, vocab_size=64.
    # Decoder timesteps/beams are folded into the batch dim to amortise the launch:
    # B = 4 sequences * 32 timesteps = 128 rows per pallas_call.
    E, V = 32, 64
    B = 4 * 32

    key = jax.random.PRNGKey(0)
    k_h, k_c, k_w1, k_b1, k_w2, k_b2 = jax.random.split(key, 6)

    hidden = jax.random.normal(k_h, (B, E), dtype=jnp.float32)
    context = jax.random.normal(k_c, (B, E), dtype=jnp.float32)

    # Params (shapes follow nn.Linear(embed*2, embed), nn.Linear(embed, vocab)).
    w1 = jax.random.normal(k_w1, (E, 2 * E), dtype=jnp.float32) * (1.0 / jnp.sqrt(2 * E))
    b1 = jax.random.normal(k_b1, (E,), dtype=jnp.float32) * 0.01
    w2 = jax.random.normal(k_w2, (V, E), dtype=jnp.float32) * (1.0 / jnp.sqrt(E))
    b2 = jax.random.normal(k_b2, (V,), dtype=jnp.float32) * 0.01

    ref = deep_output_layer_ref(hidden, context, w1, b1, w2, b2)

    # f32 path (tight tolerance).
    out = deep_output_layer(hidden, context, w1, b1, w2, b2)
    out = jax.block_until_ready(out)
    assert out.shape == (B, V), out.shape
    assert jnp.allclose(out, ref, atol=1e-4, rtol=1e-4), "f32 mismatch vs reference"

    # bf16 weight/activation path (the HBM-traffic lever from the perf review):
    # f32 MXU accumulation + f32 bias adds keep it close to the f32 reference.
    out_bf16 = deep_output_layer(hidden, context, w1, b1, w2, b2, compute_dtype=jnp.bfloat16)
    out_bf16 = jax.block_until_ready(out_bf16)
    assert out_bf16.shape == (B, V), out_bf16.shape
    assert jnp.allclose(out_bf16, ref, atol=1e-1, rtol=5e-2), "bf16 mismatch vs reference"

    print("KERNEL_OK")
</pallas_src>

<mosaic_0001>
module attributes {stable_mosaic.version = 11 : i64} {
  func.func @_layer1_kernel(%arg0: memref<128x64xf32, #tpu.memory_space<vmem>>, %arg1: memref<64x32xf32, #tpu.memory_space<vmem>>, %arg2: memref<1x32xf32, #tpu.memory_space<vmem>>, %arg3: memref<128x32xf32, #tpu.memory_space<vmem>>) attributes {dimension_semantics = [], scalar_prefetch = 0 : i64, scratch_operands = 0 : i64, tpu.core_type = #tpu.core_type<tc>} {
    %c0 = arith.constant 0 : index
    %c0_0 = arith.constant 0 : index
    %0 = vector.load %arg0[%c0, %c0_0] : memref<128x64xf32, #tpu.memory_space<vmem>>, vector<128x64xf32>
    %c0_1 = arith.constant 0 : index
    %c0_2 = arith.constant 0 : index
    %1 = vector.load %arg1[%c0_1, %c0_2] : memref<64x32xf32, #tpu.memory_space<vmem>>, vector<64x32xf32>
    %cst = arith.constant dense<0.000000e+00> : vector<128x32xf32>
    %2 = tpu.matmul %0, %1, %cst {dimension_numbers = #tpu.dot_dimension_numbers<[1], [0], [0], [1], [0, 0, 1, 1], [], []>} : vector<128x64xf32>, vector<64x32xf32>, vector<128x32xf32> -> vector<128x32xf32>
    %c0_3 = arith.constant 0 : index
    %c0_4 = arith.constant 0 : index
    %3 = vector.load %arg2[%c0_3, %c0_4] : memref<1x32xf32, #tpu.memory_space<vmem>>, vector<1x32xf32>
    %4 = vector.broadcast %3 : vector<1x32xf32> to vector<128x32xf32>
    %5 = arith.addf %2, %4 : vector<128x32xf32>
    %cst_5 = arith.constant 0.00999999977 : f32
    %6 = vector.broadcast %cst_5 : f32 to vector<128x32xf32>
    %7 = arith.mulf %6, %5 : vector<128x32xf32>
    %8 = arith.maximumf %5, %7 : vector<128x32xf32>
    %c0_6 = arith.constant 0 : index
    %c0_7 = arith.constant 0 : index
    %9 = vector.load %arg3[%c0_6, %c0_7] : memref<128x32xf32, #tpu.memory_space<vmem>>, vector<128x32xf32>
    tpu.vector_store %arg3[%c0_6, %c0_7], %8 {strides = array<i32>} : memref<128x32xf32, #tpu.memory_space<vmem>>, vector<128x32xf32>,
    return
  }
}

</mosaic_0001>

<bundles_post_ra>
// kernel: tpu_custom_call.1
= control target key start
LH: loop header
LB: loop body
LE: loop exit
PB: predicated region body
PF: predicated region fallthrough
CT: control target
= control target key end

     0   :  { %vm45_vm0 = vcmask 523264   ;;  %vm271_vm1 = vcmask 261120   ;;  %s590_s1 = inlined_call_operand.vmem [shape: f32[64,32], index: 1, kind: input, shape index: {}]   ;;  %s591_s0 = inlined_call_operand.vmem [shape: f32[128,64], index: 0, kind: input, shape index: {}]   ;;  %s592_s2 = inlined_call_operand.vmem [shape: f32[1,32], index: 2, kind: input, shape index: {}]   ;;  %s593_s3 = inlined_call_operand.vmem [shape: f32[128,32], index: 3, kind: output, shape index: {}]  }
   0x1   :  { %v30_v0 = vld [vmem:[%s590_s1] sm:$0xff]  ;;  %v31_v1 = vld [vmem:[%s590_s1 + $0x8] sm:$0xff]  ;;  %v32_v2 = vld [vmem:[%s590_s1 + $0x10] sm:$0xff] }
   0x2   :  { %v373_v3 = vpack.c.bf16 %v31_v1, %v30_v0  ;;  %v33_v4 = vld [vmem:[%s590_s1 + $0x18] sm:$0xff]  ;;  %v34_v6 = vld [vmem:[%s590_s1 + $0x20] sm:$0xff]  ;;  %v35_v7 = vld [vmem:[%s590_s1 + $0x28] sm:$0xff] }
   0x3   :  { %v377_v5 = vpack.c.bf16 %v33_v4, %v32_v2  ;;  %v14_v8 = vld [vmem:[%s591_s0] sm:$0xff]  ;;  %v381_v10 = vpack.c.bf16 %v35_v7, %v34_v6  ;;  %v36_v11 = vld [vmem:[%s590_s1 + $0x30] sm:$0xff]  ;;  %v37_v12 = vld [vmem:[%s590_s1 + $0x38] sm:$0xff] }
   0x4   :  { %374 = vmatprep.subr.bf16.mxu0 %v373_v3  ;;  %389 = vmatprep.subr.bf16.mxu1 %v373_v3  ;;  %v22_v9 = vld [vmem:[%s591_s0 + $0x40] sm:$0xff]  ;;  %v385_v13 = vpack.c.bf16 %v37_v12, %v36_v11  ;;  %v15_v14 = vld [vmem:[%s591_s0 + $0x8] sm:$0xff]  ;;  %v16_v16 = vld [vmem:[%s591_s0 + $0x10] sm:$0xff] }
   0x5   :  { %376 = vmatpush3.bf16.msra.mxu0 %v373_v3  ;;  %393 = vmatpush3.bf16.msra.mxu1 %v373_v3  ;;  %v23_v15 = vld [vmem:[%s591_s0 + $0x48] sm:$0xff]  ;;  %v24_v17 = vld [vmem:[%s591_s0 + $0x50] sm:$0xff]  ;;  %v17_v18 = vld [vmem:[%s591_s0 + $0x18] sm:$0xff] }
   0x6   :  { %378 = vmatprep.subr.bf16.mxu0 %v377_v5  ;;  %390 = vmatprep.subr.bf16.mxu1 %v377_v5  ;;  %v25_v19 = vld [vmem:[%s591_s0 + $0x58] sm:$0xff]  ;;  %v18_v20 = vld [vmem:[%s591_s0 + $0x20] sm:$0xff]  ;;  %v19_v22 = vld [vmem:[%s591_s0 + $0x28] sm:$0xff] }
   0x7   :  { %349 = vmatprep.mubr.msk.f32.mxu0 %vm45_vm0, %v14_v8  ;;  %361 = vmatprep.mubr.msk.f32.mxu1 %vm45_vm0, %v22_v9  ;;  %v26_v21 = vld [vmem:[%s591_s0 + $0x60] sm:$0xff]  ;;  %v27_v23 = vld [vmem:[%s591_s0 + $0x68] sm:$0xff]  ;;  %v20_v24 = vld [vmem:[%s591_s0 + $0x30] sm:$0xff] }
   0x8   :  { %v28_v25 = vld [vmem:[%s591_s0 + $0x70] sm:$0xff]  ;;  %v21_v26 = vld [vmem:[%s591_s0 + $0x38] sm:$0xff]  ;;  %v508_v28 = vld [vmem:[%s592_s2] ss:$0 sm:$0xff] }
   0x9   :  { %380 = vmatpush3.bf16.msra.mxu0 %v377_v5  ;;  %394 = vmatpush3.bf16.msra.mxu1 %v377_v5  ;;  %v29_v27 = vld [vmem:[%s591_s0 + $0x78] sm:$0xff] }
   0xa   :  { %382 = vmatprep.subr.bf16.mxu0 %v381_v10  ;;  %391 = vmatprep.subr.bf16.mxu1 %v381_v10 }
   0xd   :  { %384 = vmatpush3.bf16.msra.mxu0 %v381_v10  ;;  %395 = vmatpush3.bf16.msra.mxu1 %v381_v10 }
   0xe   :  { %386 = vmatprep.subr.bf16.mxu0 %v385_v13  ;;  %392 = vmatprep.subr.bf16.mxu1 %v385_v13 }
  0x11   :  { %388 = vmatpush3.bf16.msra.mxu0 %v385_v13  ;;  %396 = vmatpush3.bf16.msra.mxu1 %v385_v13 }
  0x14   :  { %350 = vmatmul.mubr.msk.f32.vlgmr.msra.gmra.mrb[0].mxu0 %vm45_vm0, %v15_v14  ;;  %362 = vmatmul.mubr.msk.f32.vlgmr.msra.gmra.mrb[0].mxu1 %vm45_vm0, %v23_v15 }
  0x15   :  { %352 = vmatprep.mubr.msk.f32.mxu0 %vm45_vm0, %v16_v16  ;;  %364 = vmatprep.mubr.msk.f32.mxu1 %vm45_vm0, %v24_v17 }
  0x18   :  { %353 = vmatmul.mubr.msk.f32.gmra.mrb[2].mxu0 %vm45_vm0, %v17_v18  ;;  %365 = vmatmul.mubr.msk.f32.gmra.mrb[2].mxu1 %vm45_vm0, %v25_v19 }
  0x19   :  { %355 = vmatprep.mubr.msk.f32.mxu0 %vm45_vm0, %v18_v20  ;;  %367 = vmatprep.mubr.msk.f32.mxu1 %vm45_vm0, %v26_v21 }
  0x1c   :  { %356 = vmatmul.mubr.msk.f32.gmra.mrb[4].mxu0 %vm45_vm0, %v19_v22  ;;  %368 = vmatmul.mubr.msk.f32.gmra.mrb[4].mxu1 %vm45_vm0, %v27_v23 }
  0x1d   :  { %358 = vmatprep.mubr.msk.f32.mxu0 %vm45_vm0, %v20_v24  ;;  %370 = vmatprep.mubr.msk.f32.mxu1 %vm45_vm0, %v28_v25 }
  0x20   :  { %359 = vmatmul.mubr.msk.f32.gmra.mrb[6].mxu0 %vm45_vm0, %v21_v26  ;;  %371 = vmatmul.mubr.msk.f32.gmra.mrb[6].mxu1 %vm45_vm0, %v29_v27 }
  0xe7   :  { %v351_v29 = vpop.f32.mrb[0].mxu0  ;;  %v363_v30 = vpop.f32.mrb[0].mxu1 }
  0xe8   :  { %v166_v31 = vadd.f32 %v351_v29, %v508_v28  ;;  %v206_v32 = vadd.f32 %v363_v30, %v508_v28  ;;  %v160_v33 = vpop.f32.mrb[1].mxu0  ;;  %v200_v34 = vpop.f32.mrb[1].mxu1 }
  0xe9   :  { %v161_v35 = vadd.f32 %v508_v28, %v160_v33  ;;  %v201_v36 = vadd.f32 %v508_v28, %v200_v34 }
  0xea   :  { %v240_v37 = vmul.f32 0.01, %v166_v31  ;;  %v248_v38 = vmul.f32 0.01, %v206_v32 }
  0xeb   :  { %v239_v39 = vmul.f32 0.01, %v161_v35  ;;  %v247_v40 = vmul.f32 0.01, %v201_v36  ;;  %v354_v41 = vpop.f32.mrb[2].mxu0  ;;  %v366_v42 = vpop.f32.mrb[2].mxu1 }
  0xec   :  { %v256_v43 = vmax.f32 %v166_v31, %v240_v37  ;;  %v264_v44 = vmax.f32 %v206_v32, %v248_v38  ;;  %v176_v45 = vadd.f32 %v354_v41, %v508_v28  ;;  %v216_v46 = vadd.f32 %v366_v42, %v508_v28  ;;  %v170_v47 = vpop.f32.mrb[3].mxu0  ;;  %v210_v48 = vpop.f32.mrb[3].mxu1 }
  0xed   :  { %v255_v49 = vmax.f32 %v161_v35, %v239_v39  ;;  %v263_v50 = vmax.f32 %v201_v36, %v247_v40  ;;  %v171_v51 = vadd.f32 %v508_v28, %v170_v47  ;;  %v211_v52 = vadd.f32 %v508_v28, %v210_v48 }
  0xee   :  { %273 = vst.msk [vmem:[%s593_s3 + $0x8] sm:$0xff] %vm271_vm1, %v256_v43  ;;  %281 = vst.msk [vmem:[%s593_s3 + $0x48] sm:$0xff] %vm271_vm1, %v264_v44  ;;  %v242_v53 = vmul.f32 0.01, %v176_v45  ;;  %v250_v54 = vmul.f32 0.01, %v216_v46 }
  0xef   :  { %272 = vst.msk [vmem:[%s593_s3] sm:$0xff] %vm271_vm1, %v255_v49  ;;  %280 = vst.msk [vmem:[%s593_s3 + $0x40] sm:$0xff] %vm271_vm1, %v263_v50  ;;  %v241_v55 = vmul.f32 0.01, %v171_v51  ;;  %v249_v56 = vmul.f32 0.01, %v211_v52 }
  0xf0   :  { %v357_v57 = vpop.f32.mrb[4].mxu0  ;;  %v369_v58 = vpop.f32.mrb[4].mxu1  ;;  %v258_v59 = vmax.f32 %v176_v45, %v242_v53  ;;  %v266_v60 = vmax.f32 %v216_v46, %v250_v54 }
  0xf1   :  { %v186_v61 = vadd.f32 %v357_v57, %v508_v28  ;;  %v226_v62 = vadd.f32 %v369_v58, %v508_v28  ;;  %v180_v63 = vpop.f32.mrb[5].mxu0  ;;  %v220_v0 = vpop.f32.mrb[5].mxu1  ;;  %v257_v1 = vmax.f32 %v171_v51, %v241_v55  ;;  %v265_v2 = vmax.f32 %v211_v52, %v249_v56 }
  0xf2   :  { %v181_v3 = vadd.f32 %v508_v28, %v180_v63  ;;  %v221_v4 = vadd.f32 %v508_v28, %v220_v0  ;;  %275 = vst.msk [vmem:[%s593_s3 + $0x18] sm:$0xff] %vm271_vm1, %v258_v59  ;;  %283 = vst.msk [vmem:[%s593_s3 + $0x58] sm:$0xff] %vm271_vm1, %v266_v60 }
  0xf3   :  { %v244_v5 = vmul.f32 0.01, %v186_v61  ;;  %v252_v6 = vmul.f32 0.01, %v226_v62  ;;  %274 = vst.msk [vmem:[%s593_s3 + $0x10] sm:$0xff] %vm271_vm1, %v257_v1  ;;  %282 = vst.msk [vmem:[%s593_s3 + $0x50] sm:$0xff] %vm271_vm1, %v265_v2 }
  0xf4   :  { %v243_v7 = vmul.f32 0.01, %v181_v3  ;;  %v251_v8 = vmul.f32 0.01, %v221_v4  ;;  %v360_v9 = vpop.f32.mrb[6].mxu0  ;;  %v372_v10 = vpop.f32.mrb[6].mxu1 }
  0xf5   :  { %v260_v11 = vmax.f32 %v186_v61, %v244_v5  ;;  %v268_v12 = vmax.f32 %v226_v62, %v252_v6  ;;  %v196_v13 = vadd.f32 %v360_v9, %v508_v28  ;;  %v236_v14 = vadd.f32 %v372_v10, %v508_v28  ;;  %v190_v15 = vpop.f32.mrb[7].mxu0  ;;  %v230_v16 = vpop.f32.mrb[7].mxu1 }
  0xf6   :  { %v259_v17 = vmax.f32 %v181_v3, %v243_v7  ;;  %v267_v18 = vmax.f32 %v221_v4, %v251_v8  ;;  %v191_v19 = vadd.f32 %v508_v28, %v190_v15  ;;  %v231_v20 = vadd.f32 %v508_v28, %v230_v16 }
  0xf7   :  { %277 = vst.msk [vmem:[%s593_s3 + $0x28] sm:$0xff] %vm271_vm1, %v260_v11  ;;  %285 = vst.msk [vmem:[%s593_s3 + $0x68] sm:$0xff] %vm271_vm1, %v268_v12  ;;  %v246_v21 = vmul.f32 0.01, %v196_v13  ;;  %v254_v22 = vmul.f32 0.01, %v236_v14 }
  0xf8   :  { %276 = vst.msk [vmem:[%s593_s3 + $0x20] sm:$0xff] %vm271_vm1, %v259_v17  ;;  %284 = vst.msk [vmem:[%s593_s3 + $0x60] sm:$0xff] %vm271_vm1, %v267_v18  ;;  %v245_v23 = vmul.f32 0.01, %v191_v19  ;;  %v253_v24 = vmul.f32 0.01, %v231_v20 }
  0xf9   :  { %v262_v25 = vmax.f32 %v196_v13, %v246_v21  ;;  %v270_v26 = vmax.f32 %v236_v14, %v254_v22 }
  0xfa   :  { %v261_v27 = vmax.f32 %v191_v19, %v245_v23  ;;  %v269_v28 = vmax.f32 %v231_v20, %v253_v24 }
  0xfb   :  { %279 = vst.msk [vmem:[%s593_s3 + $0x38] sm:$0xff] %vm271_vm1, %v262_v25  ;;  %287 = vst.msk [vmem:[%s593_s3 + $0x78] sm:$0xff] %vm271_vm1, %v270_v26 }
  0xfc   :  { %278 = vst.msk [vmem:[%s593_s3 + $0x30] sm:$0xff] %vm271_vm1, %v261_v27  ;;  %286 = vst.msk [vmem:[%s593_s3 + $0x70] sm:$0xff] %vm271_vm1, %v269_v28 }

</bundles_post_ra>
